<compile_context>
chip_gen: v7x
topology: tpu7x:2x2x1
jax: 0.10.0
libtpu: 0.0.40
codegen_flags: <defaults>
</compile_context>

<pallas_src>
import math
import jax
import jax.numpy as jnp
from jax import lax
from jax.experimental import pallas as pl
from jax.experimental.pallas import tpu as pltpu

# Small, module-consistent shapes.
S, B, E, H, FF = 8, 2, 32, 4, 64     # seq, batch, input_dim, num_heads, hidden_dim
DH = E // H                          # head dim
SB = S * B                           # rows processed per invocation
EPS = 1e-5                           # nn.LayerNorm default eps
NEG = -1e30                          # mask value (underflows to 0 after exp)


def encoder_layer_kernel(x_ref, wqkv_ref, bqkv_ref, wo_ref, bo_ref,
                         g1_ref, be1_ref, w1_ref, bf1_ref, w2_ref, bf2_ref,
                         g2_ref, be2_ref, o_ref):
    x = x_ref[...]                                         # (SB, E), row r = s*B + b

    # ---- QKV projection over all B*S rows at once (weights pre-transposed (E, 3E);
    #      1/sqrt(DH) already folded into the q columns of weight and bias) ----
    qkv = jnp.dot(x, wqkv_ref[...],
                  preferred_element_type=jnp.float32) + bqkv_ref[...]   # (SB, 3E)
    q = qkv[:, 0 * E:1 * E]
    k = qkv[:, 1 * E:2 * E]
    v = qkv[:, 2 * E:3 * E]

    # ---- same-batch mask: rows i and j belong to the same batch element iff i%B == j%B ----
    rows = lax.broadcasted_iota(jnp.int32, (SB, SB), 0)
    cols = lax.broadcasted_iota(jnp.int32, (SB, SB), 1)
    same_batch = (rows % B) == (cols % B)                  # (SB, SB) bool

    dn = (((1,), (1,)), ((), ()))                          # q @ k.T without explicit transpose
    wo_t = wo_ref[...]                                     # (E, E) pre-transposed out_proj
    attn = jnp.zeros((SB, E), jnp.float32)
    for h in range(H):                                     # static unroll over heads
        sl = slice(h * DH, (h + 1) * DH)
        s = lax.dot_general(q[:, sl], k[:, sl], dn,
                            preferred_element_type=jnp.float32)         # (SB, SB)
        s = jnp.where(same_batch, s, NEG)                  # block cross-batch attention
        s = s - jnp.max(s, axis=-1, keepdims=True)
        p = jnp.exp(s)
        p = p / jnp.sum(p, axis=-1, keepdims=True)         # exact divide (tolerance-safe)
        hv = jnp.dot(p, v[:, sl], preferred_element_type=jnp.float32)   # (SB, DH)
        # fold out_proj per head -> no concatenate
        attn = attn + jnp.dot(hv, wo_t[sl, :], preferred_element_type=jnp.float32)
    attn = attn + bo_ref[...]

    # ---- residual + LayerNorm 1 ----
    x1 = x + attn
    mu = jnp.mean(x1, axis=-1, keepdims=True)
    var = jnp.mean((x1 - mu) ** 2, axis=-1, keepdims=True)
    x1 = (x1 - mu) * lax.rsqrt(var + EPS) * g1_ref[...] + be1_ref[...]

    # ---- feed forward: Linear -> ReLU -> Linear (weights pre-transposed) ----
    h1 = jnp.dot(x1, w1_ref[...], preferred_element_type=jnp.float32) + bf1_ref[...]
    h1 = jnp.maximum(h1, 0.0)
    ff = jnp.dot(h1, w2_ref[...], preferred_element_type=jnp.float32) + bf2_ref[...]

    # ---- residual + LayerNorm 2 ----
    x2 = x1 + ff
    mu2 = jnp.mean(x2, axis=-1, keepdims=True)
    var2 = jnp.mean((x2 - mu2) ** 2, axis=-1, keepdims=True)
    x2 = (x2 - mu2) * lax.rsqrt(var2 + EPS) * g2_ref[...] + be2_ref[...]

    o_ref[...] = x2.astype(o_ref.dtype)


@jax.jit
def transformer_encoder_layer(x_sbe, kparams):
    """x_sbe: (S, B, E) float32, PyTorch MultiheadAttention default layout.
    kparams: kernel-layout parameters from prepare_params()."""
    x2d = x_sbe.reshape(SB, E)           # contiguity-preserving (free) reshape, no transpose

    def vmem():
        return pl.BlockSpec(memory_space=pltpu.MemorySpace.VMEM)

    out2d = pl.pallas_call(
        encoder_layer_kernel,
        out_shape=jax.ShapeDtypeStruct((SB, E), jnp.float32),
        in_specs=[vmem() for _ in range(1 + len(kparams))],
        out_specs=vmem(),
    )(x2d, *kparams)
    # TODO(synk): with E=32 the output store is a masked partial vst; a lane-dense slab
    # would only pay off at realistic (larger) E / fused-layer shapes.
    return out2d.reshape(S, B, E)


def init_params(key):
    """Parameters in PyTorch layout (as nn.MultiheadAttention / nn.Linear store them)."""
    ks = jax.random.split(key, 8)
    std = 0.05
    wqkv = jax.random.normal(ks[0], (3 * E, E), jnp.float32) * std   # in_proj_weight
    bqkv = jax.random.normal(ks[1], (1, 3 * E), jnp.float32) * std   # in_proj_bias
    wo = jax.random.normal(ks[2], (E, E), jnp.float32) * std         # out_proj.weight
    bo = jax.random.normal(ks[3], (1, E), jnp.float32) * std         # out_proj.bias
    g1 = jnp.ones((1, E), jnp.float32)                               # layer_norm1.weight
    be1 = jnp.zeros((1, E), jnp.float32)                             # layer_norm1.bias
    w1 = jax.random.normal(ks[4], (FF, E), jnp.float32) * std        # ff Linear1.weight
    bf1 = jax.random.normal(ks[5], (1, FF), jnp.float32) * std       # ff Linear1.bias
    w2 = jax.random.normal(ks[6], (E, FF), jnp.float32) * std        # ff Linear2.weight
    bf2 = jax.random.normal(ks[7], (1, E), jnp.float32) * std        # ff Linear2.bias
    g2 = jnp.ones((1, E), jnp.float32)                               # layer_norm2.weight
    be2 = jnp.zeros((1, E), jnp.float32)                             # layer_norm2.bias
    return (wqkv, bqkv, wo, bo, g1, be1, w1, bf1, w2, bf2, g2, be2)


def prepare_params(params):
    """One-time host-side prep: pre-transpose weights, fold 1/sqrt(DH) into q weight+bias."""
    wqkv, bqkv, wo, bo, g1, be1, w1, bf1, w2, bf2, g2, be2 = params
    scale = 1.0 / math.sqrt(DH)
    col_scale = jnp.concatenate([jnp.full((E,), scale, jnp.float32),
                                 jnp.ones((2 * E,), jnp.float32)])      # scale q columns only
    wqkv_t = wqkv.T * col_scale[None, :]        # (E, 3E)
    bqkv_s = bqkv * col_scale[None, :]          # (1, 3E)
    return (wqkv_t, bqkv_s, wo.T, bo, g1, be1, w1.T, bf1, w2.T, bf2, g2, be2)


def reference(x_sbe, params):
    """Pure-JAX reference in PyTorch semantics (un-transposed params)."""
    wqkv, bqkv, wo, bo, g1, be1, w1, bf1, w2, bf2, g2, be2 = params

    def ln(y, g, b):
        mu = jnp.mean(y, axis=-1, keepdims=True)
        var = jnp.mean((y - mu) ** 2, axis=-1, keepdims=True)
        return (y - mu) * lax.rsqrt(var + EPS) * g[0] + b[0]

    def one(x_se):                                  # (S, E) per batch element
        qkv = x_se @ wqkv.T + bqkv[0]
        q, k, v = jnp.split(qkv, 3, axis=-1)
        qh = q.reshape(S, H, DH).transpose(1, 0, 2) / math.sqrt(DH)
        kh = k.reshape(S, H, DH).transpose(1, 0, 2)
        vh = v.reshape(S, H, DH).transpose(1, 0, 2)
        s = jnp.einsum('hqd,hkd->hqk', qh, kh)
        p = jax.nn.softmax(s, axis=-1)
        a = jnp.einsum('hqk,hkd->hqd', p, vh).transpose(1, 0, 2).reshape(S, E)
        a = a @ wo.T + bo[0]
        x1 = ln(x_se + a, g1, be1)
        ff = jax.nn.relu(x1 @ w1.T + bf1[0]) @ w2.T + bf2[0]
        return ln(x1 + ff, g2, be2)

    return jax.vmap(one, in_axes=1, out_axes=1)(x_sbe)


if __name__ == "__main__":
    key = jax.random.PRNGKey(0)
    kx, kp = jax.random.split(key)
    x = jax.random.normal(kx, (S, B, E), jnp.float32)    # (seq, batch, embed)
    params = init_params(kp)                             # PyTorch-layout params
    kparams = prepare_params(params)                     # kernel-layout params (prepped once)

    out = transformer_encoder_layer(x, kparams)
    out = jax.block_until_ready(out)

    ref = reference(x, params)
    assert out.shape == (S, B, E)
    assert jnp.allclose(out, ref, rtol=1e-4, atol=1e-4), "mismatch vs JAX reference"
    print("KERNEL_OK")
</pallas_src>

<mosaic_0001>
module attributes {stable_mosaic.version = 11 : i64} {
  func.func @encoder_layer_kernel(%arg0: memref<16x32xf32, #tpu.memory_space<vmem>>, %arg1: memref<32x96xf32, #tpu.memory_space<vmem>>, %arg2: memref<1x96xf32, #tpu.memory_space<vmem>>, %arg3: memref<32x32xf32, #tpu.memory_space<vmem>>, %arg4: memref<1x32xf32, #tpu.memory_space<vmem>>, %arg5: memref<1x32xf32, #tpu.memory_space<vmem>>, %arg6: memref<1x32xf32, #tpu.memory_space<vmem>>, %arg7: memref<32x64xf32, #tpu.memory_space<vmem>>, %arg8: memref<1x64xf32, #tpu.memory_space<vmem>>, %arg9: memref<64x32xf32, #tpu.memory_space<vmem>>, %arg10: memref<1x32xf32, #tpu.memory_space<vmem>>, %arg11: memref<1x32xf32, #tpu.memory_space<vmem>>, %arg12: memref<1x32xf32, #tpu.memory_space<vmem>>, %arg13: memref<16x32xf32, #tpu.memory_space<vmem>>) attributes {dimension_semantics = [], scalar_prefetch = 0 : i64, scratch_operands = 0 : i64, tpu.core_type = #tpu.core_type<tc>} {
    %c0 = arith.constant 0 : index
    %c0_0 = arith.constant 0 : index
    %0 = vector.load %arg0[%c0, %c0_0] : memref<16x32xf32, #tpu.memory_space<vmem>>, vector<16x32xf32>
    %c0_1 = arith.constant 0 : index
    %c0_2 = arith.constant 0 : index
    %1 = vector.load %arg1[%c0_1, %c0_2] : memref<32x96xf32, #tpu.memory_space<vmem>>, vector<32x96xf32>
    %cst = arith.constant dense<0.000000e+00> : vector<16x96xf32>
    %2 = tpu.matmul %0, %1, %cst {dimension_numbers = #tpu.dot_dimension_numbers<[1], [0], [0], [1], [0, 0, 1, 1], [], []>} : vector<16x32xf32>, vector<32x96xf32>, vector<16x96xf32> -> vector<16x96xf32>
    %c0_3 = arith.constant 0 : index
    %c0_4 = arith.constant 0 : index
    %3 = vector.load %arg2[%c0_3, %c0_4] : memref<1x96xf32, #tpu.memory_space<vmem>>, vector<1x96xf32>
    %4 = vector.broadcast %3 : vector<1x96xf32> to vector<16x96xf32>
    %5 = arith.addf %2, %4 : vector<16x96xf32>
    %6 = vector.extract_strided_slice %5 {offsets = [0, 0], sizes = [16, 32], strides = [1, 1]} : vector<16x96xf32> to vector<16x32xf32>
    %7 = vector.extract_strided_slice %5 {offsets = [0, 32], sizes = [16, 32], strides = [1, 1]} : vector<16x96xf32> to vector<16x32xf32>
    %8 = vector.extract_strided_slice %5 {offsets = [0, 64], sizes = [16, 32], strides = [1, 1]} : vector<16x96xf32> to vector<16x32xf32>
    %9 = tpu.iota {dimensions = array<i32: 0>} : vector<16x16xi32>
    %10 = tpu.iota {dimensions = array<i32: 1>} : vector<16x16xi32>
    %c2_i32 = arith.constant 2 : i32
    %c0_i32 = arith.constant 0 : i32
    %11 = arith.cmpi eq, %c2_i32, %c0_i32 : i32
    %c1_i32 = arith.constant 1 : i32
    %12 = arith.select %11, %c1_i32, %c2_i32 : i32
    %13 = vector.broadcast %12 : i32 to vector<16x16xi32>
    %14 = arith.remsi %9, %13 : vector<16x16xi32>
    %c0_i32_5 = arith.constant 0 : i32
    %15 = vector.broadcast %c0_i32_5 : i32 to vector<16x16xi32>
    %16 = arith.cmpi ne, %14, %15 : vector<16x16xi32>
    %c0_i32_6 = arith.constant 0 : i32
    %17 = vector.broadcast %c0_i32_6 : i32 to vector<16x16xi32>
    %18 = arith.cmpi slt, %14, %17 : vector<16x16xi32>
    %c0_i32_7 = arith.constant 0 : i32
    %19 = arith.cmpi slt, %12, %c0_i32_7 : i32
    %20 = vector.broadcast %19 : i1 to vector<16x16xi1>
    %21 = vector.broadcast %20 : vector<16x16xi1> to vector<16x16xi1>
    %22 = arith.xori %18, %21 : vector<16x16xi1>
    %23 = arith.andi %22, %16 : vector<16x16xi1>
    %24 = vector.broadcast %12 : i32 to vector<16x16xi32>
    %25 = arith.addi %14, %24 : vector<16x16xi32>
    %26 = arith.select %23, %25, %14 : vector<16x16xi1>, vector<16x16xi32>
    %c2_i32_8 = arith.constant 2 : i32
    %c0_i32_9 = arith.constant 0 : i32
    %27 = arith.cmpi eq, %c2_i32_8, %c0_i32_9 : i32
    %c1_i32_10 = arith.constant 1 : i32
    %28 = arith.select %27, %c1_i32_10, %c2_i32_8 : i32
    %29 = vector.broadcast %28 : i32 to vector<16x16xi32>
    %30 = arith.remsi %10, %29 : vector<16x16xi32>
    %c0_i32_11 = arith.constant 0 : i32
    %31 = vector.broadcast %c0_i32_11 : i32 to vector<16x16xi32>
    %32 = arith.cmpi ne, %30, %31 : vector<16x16xi32>
    %c0_i32_12 = arith.constant 0 : i32
    %33 = vector.broadcast %c0_i32_12 : i32 to vector<16x16xi32>
    %34 = arith.cmpi slt, %30, %33 : vector<16x16xi32>
    %c0_i32_13 = arith.constant 0 : i32
    %35 = arith.cmpi slt, %28, %c0_i32_13 : i32
    %36 = vector.broadcast %35 : i1 to vector<16x16xi1>
    %37 = vector.broadcast %36 : vector<16x16xi1> to vector<16x16xi1>
    %38 = arith.xori %34, %37 : vector<16x16xi1>
    %39 = arith.andi %38, %32 : vector<16x16xi1>
    %40 = vector.broadcast %28 : i32 to vector<16x16xi32>
    %41 = arith.addi %30, %40 : vector<16x16xi32>
    %42 = arith.select %39, %41, %30 : vector<16x16xi1>, vector<16x16xi32>
    %43 = arith.cmpi eq, %26, %42 : vector<16x16xi32>
    %c0_14 = arith.constant 0 : index
    %c0_15 = arith.constant 0 : index
    %44 = vector.load %arg3[%c0_14, %c0_15] : memref<32x32xf32, #tpu.memory_space<vmem>>, vector<32x32xf32>
    %cst_16 = arith.constant 0.000000e+00 : f32
    %45 = vector.broadcast %cst_16 : f32 to vector<16x32xf32>
    %46 = vector.extract_strided_slice %6 {offsets = [0, 0], sizes = [16, 8], strides = [1, 1]} : vector<16x32xf32> to vector<16x8xf32>
    %47 = vector.extract_strided_slice %7 {offsets = [0, 0], sizes = [16, 8], strides = [1, 1]} : vector<16x32xf32> to vector<16x8xf32>
    %cst_17 = arith.constant dense<0.000000e+00> : vector<16x16xf32>
    %48 = tpu.matmul %46, %47, %cst_17 {dimension_numbers = #tpu.dot_dimension_numbers<[1], [1], [0], [0], [0, 0, 1, 0], [], []>} : vector<16x8xf32>, vector<16x8xf32>, vector<16x16xf32> -> vector<16x16xf32>
    %cst_18 = arith.constant -1.000000e+30 : f32
    %49 = vector.broadcast %cst_18 : f32 to vector<16x16xf32>
    %50 = arith.select %43, %48, %49 : vector<16x16xi1>, vector<16x16xf32>
    %cst_19 = arith.constant dense<0xFF800000> : vector<16xf32>
    %51 = vector.multi_reduction <maximumf>, %50, %cst_19 [1] : vector<16x16xf32> to vector<16xf32>
    %52 = vector.shape_cast %51 : vector<16xf32> to vector<16x1xf32>
    %53 = vector.broadcast %52 : vector<16x1xf32> to vector<16x16xf32>
    %54 = arith.subf %50, %53 : vector<16x16xf32>
    %55 = math.exp %54 : vector<16x16xf32>
    %cst_20 = arith.constant dense<0.000000e+00> : vector<16xf32>
    %56 = vector.multi_reduction <add>, %55, %cst_20 [1] : vector<16x16xf32> to vector<16xf32>
    %57 = vector.shape_cast %56 : vector<16xf32> to vector<16x1xf32>
    %58 = vector.broadcast %57 : vector<16x1xf32> to vector<16x16xf32>
    %59 = arith.divf %55, %58 : vector<16x16xf32>
    %60 = vector.extract_strided_slice %8 {offsets = [0, 0], sizes = [16, 8], strides = [1, 1]} : vector<16x32xf32> to vector<16x8xf32>
    %cst_21 = arith.constant dense<0.000000e+00> : vector<16x8xf32>
    %61 = tpu.matmul %59, %60, %cst_21 {dimension_numbers = #tpu.dot_dimension_numbers<[1], [0], [0], [1], [0, 0, 1, 1], [], []>} : vector<16x16xf32>, vector<16x8xf32>, vector<16x8xf32> -> vector<16x8xf32>
    %62 = vector.extract_strided_slice %44 {offsets = [0, 0], sizes = [8, 32], strides = [1, 1]} : vector<32x32xf32> to vector<8x32xf32>
    %cst_22 = arith.constant dense<0.000000e+00> : vector<16x32xf32>
    %63 = tpu.matmul %61, %62, %cst_22 {dimension_numbers = #tpu.dot_dimension_numbers<[1], [0], [0], [1], [0, 0, 1, 1], [], []>} : vector<16x8xf32>, vector<8x32xf32>, vector<16x32xf32> -> vector<16x32xf32>
    %64 = arith.addf %45, %63 : vector<16x32xf32>
    %65 = vector.extract_strided_slice %6 {offsets = [0, 8], sizes = [16, 8], strides = [1, 1]} : vector<16x32xf32> to vector<16x8xf32>
    %66 = vector.extract_strided_slice %7 {offsets = [0, 8], sizes = [16, 8], strides = [1, 1]} : vector<16x32xf32> to vector<16x8xf32>
    %cst_23 = arith.constant dense<0.000000e+00> : vector<16x16xf32>
    %67 = tpu.matmul %65, %66, %cst_23 {dimension_numbers = #tpu.dot_dimension_numbers<[1], [1], [0], [0], [0, 0, 1, 0], [], []>} : vector<16x8xf32>, vector<16x8xf32>, vector<16x16xf32> -> vector<16x16xf32>
    %cst_24 = arith.constant -1.000000e+30 : f32
    %68 = vector.broadcast %cst_24 : f32 to vector<16x16xf32>
    %69 = arith.select %43, %67, %68 : vector<16x16xi1>, vector<16x16xf32>
    %cst_25 = arith.constant dense<0xFF800000> : vector<16xf32>
    %70 = vector.multi_reduction <maximumf>, %69, %cst_25 [1] : vector<16x16xf32> to vector<16xf32>
    %71 = vector.shape_cast %70 : vector<16xf32> to vector<16x1xf32>
    %72 = vector.broadcast %71 : vector<16x1xf32> to vector<16x16xf32>
    %73 = arith.subf %69, %72 : vector<16x16xf32>
    %74 = math.exp %73 : vector<16x16xf32>
    %cst_26 = arith.constant dense<0.000000e+00> : vector<16xf32>
    %75 = vector.multi_reduction <add>, %74, %cst_26 [1] : vector<16x16xf32> to vector<16xf32>
    %76 = vector.shape_cast %75 : vector<16xf32> to vector<16x1xf32>
    %77 = vector.broadcast %76 : vector<16x1xf32> to vector<16x16xf32>
    %78 = arith.divf %74, %77 : vector<16x16xf32>
    %79 = vector.extract_strided_slice %8 {offsets = [0, 8], sizes = [16, 8], strides = [1, 1]} : vector<16x32xf32> to vector<16x8xf32>
    %cst_27 = arith.constant dense<0.000000e+00> : vector<16x8xf32>
    %80 = tpu.matmul %78, %79, %cst_27 {dimension_numbers = #tpu.dot_dimension_numbers<[1], [0], [0], [1], [0, 0, 1, 1], [], []>} : vector<16x16xf32>, vector<16x8xf32>, vector<16x8xf32> -> vector<16x8xf32>
    %81 = vector.extract_strided_slice %44 {offsets = [8, 0], sizes = [8, 32], strides = [1, 1]} : vector<32x32xf32> to vector<8x32xf32>
    %cst_28 = arith.constant dense<0.000000e+00> : vector<16x32xf32>
    %82 = tpu.matmul %80, %81, %cst_28 {dimension_numbers = #tpu.dot_dimension_numbers<[1], [0], [0], [1], [0, 0, 1, 1], [], []>} : vector<16x8xf32>, vector<8x32xf32>, vector<16x32xf32> -> vector<16x32xf32>
    %83 = arith.addf %64, %82 : vector<16x32xf32>
    %84 = vector.extract_strided_slice %6 {offsets = [0, 16], sizes = [16, 8], strides = [1, 1]} : vector<16x32xf32> to vector<16x8xf32>
    %85 = vector.extract_strided_slice %7 {offsets = [0, 16], sizes = [16, 8], strides = [1, 1]} : vector<16x32xf32> to vector<16x8xf32>
    %cst_29 = arith.constant dense<0.000000e+00> : vector<16x16xf32>
    %86 = tpu.matmul %84, %85, %cst_29 {dimension_numbers = #tpu.dot_dimension_numbers<[1], [1], [0], [0], [0, 0, 1, 0], [], []>} : vector<16x8xf32>, vector<16x8xf32>, vector<16x16xf32> -> vector<16x16xf32>
    %cst_30 = arith.constant -1.000000e+30 : f32
    %87 = vector.broadcast %cst_30 : f32 to vector<16x16xf32>
    %88 = arith.select %43, %86, %87 : vector<16x16xi1>, vector<16x16xf32>
    %cst_31 = arith.constant dense<0xFF800000> : vector<16xf32>
    %89 = vector.multi_reduction <maximumf>, %88, %cst_31 [1] : vector<16x16xf32> to vector<16xf32>
    %90 = vector.shape_cast %89 : vector<16xf32> to vector<16x1xf32>
    %91 = vector.broadcast %90 : vector<16x1xf32> to vector<16x16xf32>
    %92 = arith.subf %88, %91 : vector<16x16xf32>
    %93 = math.exp %92 : vector<16x16xf32>
    %cst_32 = arith.constant dense<0.000000e+00> : vector<16xf32>
    %94 = vector.multi_reduction <add>, %93, %cst_32 [1] : vector<16x16xf32> to vector<16xf32>
    %95 = vector.shape_cast %94 : vector<16xf32> to vector<16x1xf32>
    %96 = vector.broadcast %95 : vector<16x1xf32> to vector<16x16xf32>
    %97 = arith.divf %93, %96 : vector<16x16xf32>
    %98 = vector.extract_strided_slice %8 {offsets = [0, 16], sizes = [16, 8], strides = [1, 1]} : vector<16x32xf32> to vector<16x8xf32>
    %cst_33 = arith.constant dense<0.000000e+00> : vector<16x8xf32>
    %99 = tpu.matmul %97, %98, %cst_33 {dimension_numbers = #tpu.dot_dimension_numbers<[1], [0], [0], [1], [0, 0, 1, 1], [], []>} : vector<16x16xf32>, vector<16x8xf32>, vector<16x8xf32> -> vector<16x8xf32>
    %100 = vector.extract_strided_slice %44 {offsets = [16, 0], sizes = [8, 32], strides = [1, 1]} : vector<32x32xf32> to vector<8x32xf32>
    %cst_34 = arith.constant dense<0.000000e+00> : vector<16x32xf32>
    %101 = tpu.matmul %99, %100, %cst_34 {dimension_numbers = #tpu.dot_dimension_numbers<[1], [0], [0], [1], [0, 0, 1, 1], [], []>} : vector<16x8xf32>, vector<8x32xf32>, vector<16x32xf32> -> vector<16x32xf32>
    %102 = arith.addf %83, %101 : vector<16x32xf32>
    %103 = vector.extract_strided_slice %6 {offsets = [0, 24], sizes = [16, 8], strides = [1, 1]} : vector<16x32xf32> to vector<16x8xf32>
    %104 = vector.extract_strided_slice %7 {offsets = [0, 24], sizes = [16, 8], strides = [1, 1]} : vector<16x32xf32> to vector<16x8xf32>
    %cst_35 = arith.constant dense<0.000000e+00> : vector<16x16xf32>
    %105 = tpu.matmul %103, %104, %cst_35 {dimension_numbers = #tpu.dot_dimension_numbers<[1], [1], [0], [0], [0, 0, 1, 0], [], []>} : vector<16x8xf32>, vector<16x8xf32>, vector<16x16xf32> -> vector<16x16xf32>
    %cst_36 = arith.constant -1.000000e+30 : f32
    %106 = vector.broadcast %cst_36 : f32 to vector<16x16xf32>
    %107 = arith.select %43, %105, %106 : vector<16x16xi1>, vector<16x16xf32>
    %cst_37 = arith.constant dense<0xFF800000> : vector<16xf32>
    %108 = vector.multi_reduction <maximumf>, %107, %cst_37 [1] : vector<16x16xf32> to vector<16xf32>
    %109 = vector.shape_cast %108 : vector<16xf32> to vector<16x1xf32>
    %110 = vector.broadcast %109 : vector<16x1xf32> to vector<16x16xf32>
    %111 = arith.subf %107, %110 : vector<16x16xf32>
    %112 = math.exp %111 : vector<16x16xf32>
    %cst_38 = arith.constant dense<0.000000e+00> : vector<16xf32>
    %113 = vector.multi_reduction <add>, %112, %cst_38 [1] : vector<16x16xf32> to vector<16xf32>
    %114 = vector.shape_cast %113 : vector<16xf32> to vector<16x1xf32>
    %115 = vector.broadcast %114 : vector<16x1xf32> to vector<16x16xf32>
    %116 = arith.divf %112, %115 : vector<16x16xf32>
    %117 = vector.extract_strided_slice %8 {offsets = [0, 24], sizes = [16, 8], strides = [1, 1]} : vector<16x32xf32> to vector<16x8xf32>
    %cst_39 = arith.constant dense<0.000000e+00> : vector<16x8xf32>
    %118 = tpu.matmul %116, %117, %cst_39 {dimension_numbers = #tpu.dot_dimension_numbers<[1], [0], [0], [1], [0, 0, 1, 1], [], []>} : vector<16x16xf32>, vector<16x8xf32>, vector<16x8xf32> -> vector<16x8xf32>
    %119 = vector.extract_strided_slice %44 {offsets = [24, 0], sizes = [8, 32], strides = [1, 1]} : vector<32x32xf32> to vector<8x32xf32>
    %cst_40 = arith.constant dense<0.000000e+00> : vector<16x32xf32>
    %120 = tpu.matmul %118, %119, %cst_40 {dimension_numbers = #tpu.dot_dimension_numbers<[1], [0], [0], [1], [0, 0, 1, 1], [], []>} : vector<16x8xf32>, vector<8x32xf32>, vector<16x32xf32> -> vector<16x32xf32>
    %121 = arith.addf %102, %120 : vector<16x32xf32>
    %c0_41 = arith.constant 0 : index
    %c0_42 = arith.constant 0 : index
    %122 = vector.load %arg4[%c0_41, %c0_42] : memref<1x32xf32, #tpu.memory_space<vmem>>, vector<1x32xf32>
    %123 = vector.broadcast %122 : vector<1x32xf32> to vector<16x32xf32>
    %124 = arith.addf %121, %123 : vector<16x32xf32>
    %125 = arith.addf %0, %124 : vector<16x32xf32>
    %cst_43 = arith.constant dense<0.000000e+00> : vector<16xf32>
    %126 = vector.multi_reduction <add>, %125, %cst_43 [1] : vector<16x32xf32> to vector<16xf32>
    %127 = vector.shape_cast %126 : vector<16xf32> to vector<16x1xf32>
    %cst_44 = arith.constant 3.200000e+01 : f32
    %128 = vector.broadcast %cst_44 : f32 to vector<16x1xf32>
    %129 = arith.divf %127, %128 : vector<16x1xf32>
    %130 = vector.broadcast %129 : vector<16x1xf32> to vector<16x32xf32>
    %131 = arith.subf %125, %130 : vector<16x32xf32>
    %132 = arith.mulf %131, %131 : vector<16x32xf32>
    %cst_45 = arith.constant dense<0.000000e+00> : vector<16xf32>
    %133 = vector.multi_reduction <add>, %132, %cst_45 [1] : vector<16x32xf32> to vector<16xf32>
    %134 = vector.shape_cast %133 : vector<16xf32> to vector<16x1xf32>
    %cst_46 = arith.constant 3.200000e+01 : f32
    %135 = vector.broadcast %cst_46 : f32 to vector<16x1xf32>
    %136 = arith.divf %134, %135 : vector<16x1xf32>
    %137 = vector.broadcast %129 : vector<16x1xf32> to vector<16x32xf32>
    %138 = arith.subf %125, %137 : vector<16x32xf32>
    %cst_47 = arith.constant 9.99999974E-6 : f32
    %139 = vector.broadcast %cst_47 : f32 to vector<16x1xf32>
    %140 = arith.addf %136, %139 : vector<16x1xf32>
    %141 = math.rsqrt %140 : vector<16x1xf32>
    %142 = vector.broadcast %141 : vector<16x1xf32> to vector<16x32xf32>
    %143 = arith.mulf %138, %142 : vector<16x32xf32>
    %c0_48 = arith.constant 0 : index
    %c0_49 = arith.constant 0 : index
    %144 = vector.load %arg5[%c0_48, %c0_49] : memref<1x32xf32, #tpu.memory_space<vmem>>, vector<1x32xf32>
    %145 = vector.broadcast %144 : vector<1x32xf32> to vector<16x32xf32>
    %146 = arith.mulf %143, %145 : vector<16x32xf32>
    %c0_50 = arith.constant 0 : index
    %c0_51 = arith.constant 0 : index
    %147 = vector.load %arg6[%c0_50, %c0_51] : memref<1x32xf32, #tpu.memory_space<vmem>>, vector<1x32xf32>
    %148 = vector.broadcast %147 : vector<1x32xf32> to vector<16x32xf32>
    %149 = arith.addf %146, %148 : vector<16x32xf32>
    %c0_52 = arith.constant 0 : index
    %c0_53 = arith.constant 0 : index
    %150 = vector.load %arg7[%c0_52, %c0_53] : memref<32x64xf32, #tpu.memory_space<vmem>>, vector<32x64xf32>
    %cst_54 = arith.constant dense<0.000000e+00> : vector<16x64xf32>
    %151 = tpu.matmul %149, %150, %cst_54 {dimension_numbers = #tpu.dot_dimension_numbers<[1], [0], [0], [1], [0, 0, 1, 1], [], []>} : vector<16x32xf32>, vector<32x64xf32>, vector<16x64xf32> -> vector<16x64xf32>
    %c0_55 = arith.constant 0 : index
    %c0_56 = arith.constant 0 : index
    %152 = vector.load %arg8[%c0_55, %c0_56] : memref<1x64xf32, #tpu.memory_space<vmem>>, vector<1x64xf32>
    %153 = vector.broadcast %152 : vector<1x64xf32> to vector<16x64xf32>
    %154 = arith.addf %151, %153 : vector<16x64xf32>
    %cst_57 = arith.constant 0.000000e+00 : f32
    %155 = vector.broadcast %cst_57 : f32 to vector<16x64xf32>
    %156 = arith.maximumf %154, %155 : vector<16x64xf32>
    %c0_58 = arith.constant 0 : index
    %c0_59 = arith.constant 0 : index
    %157 = vector.load %arg9[%c0_58, %c0_59] : memref<64x32xf32, #tpu.memory_space<vmem>>, vector<64x32xf32>
    %cst_60 = arith.constant dense<0.000000e+00> : vector<16x32xf32>
    %158 = tpu.matmul %156, %157, %cst_60 {dimension_numbers = #tpu.dot_dimension_numbers<[1], [0], [0], [1], [0, 0, 1, 1], [], []>} : vector<16x64xf32>, vector<64x32xf32>, vector<16x32xf32> -> vector<16x32xf32>
    %c0_61 = arith.constant 0 : index
    %c0_62 = arith.constant 0 : index
    %159 = vector.load %arg10[%c0_61, %c0_62] : memref<1x32xf32, #tpu.memory_space<vmem>>, vector<1x32xf32>
    %160 = vector.broadcast %159 : vector<1x32xf32> to vector<16x32xf32>
    %161 = arith.addf %158, %160 : vector<16x32xf32>
    %162 = arith.addf %149, %161 : vector<16x32xf32>
    %cst_63 = arith.constant dense<0.000000e+00> : vector<16xf32>
    %163 = vector.multi_reduction <add>, %162, %cst_63 [1] : vector<16x32xf32> to vector<16xf32>
    %164 = vector.shape_cast %163 : vector<16xf32> to vector<16x1xf32>
    %cst_64 = arith.constant 3.200000e+01 : f32
    %165 = vector.broadcast %cst_64 : f32 to vector<16x1xf32>
    %166 = arith.divf %164, %165 : vector<16x1xf32>
    %167 = vector.broadcast %166 : vector<16x1xf32> to vector<16x32xf32>
    %168 = arith.subf %162, %167 : vector<16x32xf32>
    %169 = arith.mulf %168, %168 : vector<16x32xf32>
    %cst_65 = arith.constant dense<0.000000e+00> : vector<16xf32>
    %170 = vector.multi_reduction <add>, %169, %cst_65 [1] : vector<16x32xf32> to vector<16xf32>
    %171 = vector.shape_cast %170 : vector<16xf32> to vector<16x1xf32>
    %cst_66 = arith.constant 3.200000e+01 : f32
    %172 = vector.broadcast %cst_66 : f32 to vector<16x1xf32>
    %173 = arith.divf %171, %172 : vector<16x1xf32>
    %174 = vector.broadcast %166 : vector<16x1xf32> to vector<16x32xf32>
    %175 = arith.subf %162, %174 : vector<16x32xf32>
    %cst_67 = arith.constant 9.99999974E-6 : f32
    %176 = vector.broadcast %cst_67 : f32 to vector<16x1xf32>
    %177 = arith.addf %173, %176 : vector<16x1xf32>
    %178 = math.rsqrt %177 : vector<16x1xf32>
    %179 = vector.broadcast %178 : vector<16x1xf32> to vector<16x32xf32>
    %180 = arith.mulf %175, %179 : vector<16x32xf32>
    %c0_68 = arith.constant 0 : index
    %c0_69 = arith.constant 0 : index
    %181 = vector.load %arg11[%c0_68, %c0_69] : memref<1x32xf32, #tpu.memory_space<vmem>>, vector<1x32xf32>
    %182 = vector.broadcast %181 : vector<1x32xf32> to vector<16x32xf32>
    %183 = arith.mulf %180, %182 : vector<16x32xf32>
    %c0_70 = arith.constant 0 : index
    %c0_71 = arith.constant 0 : index
    %184 = vector.load %arg12[%c0_70, %c0_71] : memref<1x32xf32, #tpu.memory_space<vmem>>, vector<1x32xf32>
    %185 = vector.broadcast %184 : vector<1x32xf32> to vector<16x32xf32>
    %186 = arith.addf %183, %185 : vector<16x32xf32>
    %c0_72 = arith.constant 0 : index
    %c0_73 = arith.constant 0 : index
    %187 = vector.load %arg13[%c0_72, %c0_73] : memref<16x32xf32, #tpu.memory_space<vmem>>, vector<16x32xf32>
    tpu.vector_store %arg13[%c0_72, %c0_73], %186 {strides = array<i32>} : memref<16x32xf32, #tpu.memory_space<vmem>>, vector<16x32xf32>,
    return
  }
}

</mosaic_0001>

<bundles_post_ra>
// kernel: transformer_encoder_layer.1
= control target key start
LH: loop header
LB: loop body
LE: loop exit
PB: predicated region body
PF: predicated region fallthrough
CT: control target
= control target key end

     0   :  { %18 = vsyncpa [#allocation3], 0  ;;  %s2434_s0 = inlined_call_operand.hbm [shape: f32[16,32], index: 0, kind: input, shape index: {}]   ;;  %s2435_s1 = inlined_call_operand.vmem [shape: f32[32,96], index: 1, kind: input, shape index: {}]   ;;  %s2436_s2 = inlined_call_operand.vmem [shape: f32[1,96], index: 2, kind: input, shape index: {}]   ;;  %s2437_s3 = inlined_call_operand.vmem [shape: f32[32,32], index: 3, kind: input, shape index: {}]   ;;  %s2438_s4 = inlined_call_operand.vmem [shape: f32[1,32], index: 4, kind: input, shape index: {}]   ;;  %s2439_s5 = inlined_call_operand.vmem [shape: f32[1,32], index: 5, kind: input, shape index: {}]   ;;  %s2440_s6 = inlined_call_operand.vmem [shape: f32[1,32], index: 6, kind: input, shape index: {}]   ;;  %s2441_s7 = inlined_call_operand.vmem [shape: f32[32,64], index: 7, kind: input, shape index: {}]   ;;  %s2442_s8 = inlined_call_operand.vmem [shape: f32[1,64], index: 8, kind: input, shape index: {}]   ;;  %s2443_s9 = inlined_call_operand.vmem [shape: f32[64,32], index: 9, kind: input, shape index: {}]   ;;  %s2444_s10 = inlined_call_operand.vmem [shape: f32[1,32], index: 10, kind: input, shape index: {}]   ;;  %s2445_s11 = inlined_call_operand.vmem [shape: f32[1,32], index: 11, kind: input, shape index: {}]   ;;  %s2446_s12 = inlined_call_operand.vmem [shape: f32[1,32], index: 12, kind: input, shape index: {}]   ;;  %s2447_s13 = inlined_call_operand.hbm [shape: f32[16,32], index: 13, kind: output, shape index: {}]  }
   0x1   :  { %19 = vsyncpa [#allocation4], 0  ;;  %s2099_s25 = smov [#allocation2]   ;;  %s2051_s29 = scalar_lea.hbm %s2434_s0, 256 }
   0x2   :  { %s25_s26 = sshll.u32 %s2099_s25, 4  ;;  %p2052_p0 = scmp.ne.s32.totalorder %s2434_s0, %s2051_s29  ;;  %s26_s26 = int_to_ptr.vmem [resolvable:$true] %s25_s26 }
   0x3   :  { %p2055_p1 = scmp.lt.u32.totalorder %s2051_s29, %s2434_s0 }
   0x5   :  { %p2057_p2 = pnand %p2055_p1, %p2052_p0 }
   0x7   :  { %2060 = shalt.err (!%p2057_p2)
}
   0x8   :  { %s2061_s17 = scalar_lea.vmem %s26_s26, 256  ;;  %p2066_p4 = scmp.lt.s32.totalorder %s26_s26, %s26_s26 }
   0x9   :  { %p2062_p3 = scmp.ne.s32.totalorder %s26_s26, %s2061_s17  ;;  %p2067_p5 = scmp.lt.s32.totalorder %s2061_s17, %s2061_s17 }
   0xb   :  { %p2068_p6 = por %p2067_p5, %p2066_p4 }
   0xd   :  { %p2069_p7 = pnand %p2068_p6, %p2062_p3 }
   0xf   :  { %2072 = shalt.err (!%p2069_p7)
}
  0x10   :  { %s2100_s18 = smov 128   ;;  %s2101_s19 = smov 8  }
  0x11   :  { %31 = dma.hbm_to_vmem [thread:$0]  %s2434_s0, 256, %s26_s26, [#allocation3], %s2100_s18, %s2100_s18, %s2101_s19  }
  0x12   :  { %2095 = dma.done.wait [#allocation3], 256  }
  0x13   :  { %2096 = vsyncadd [#allocation3], 4294967040  ;;  %vm72_vm0 = vcmask 261120   ;;  %v61_v0 = vld [vmem:[%s2435_s1] sm:$0xff]  ;;  %v62_v1 = vld [vmem:[%s2435_s1 + $0x8] sm:$0xff]  ;;  %vm207_vm1 = vcmask 64512   ;;  %v154_v31 = vlaneseq }
  0x14   :  { %v63_v2 = vld [vmem:[%s2435_s1 + $0x10] sm:$0xff]  ;;  %v1878_v3 = vpack.c.bf16 %v62_v1, %v61_v0  ;;  %v64_v4 = vld [vmem:[%s2435_s1 + $0x18] sm:$0xff]  ;;  %v2211_v5 = vld [vmem:[#allocation2] sm:$0xff]  ;;  %s2102_s1 = smov 120   ;;  %s2103_s14 = smov 96   ;;  %vm293_vm5 = vcmask 130048  }
  0x15   :  { %v1882_v6 = vpack.c.bf16 %v64_v4, %v63_v2  ;;  %1769 = vmatprep.mubr.msk.f32.mxu1 %vm72_vm0, %v2211_v5  ;;  %v2215_v7 = vld [vmem:[#allocation2 + $0x8] sm:$0xff]  ;;  %v1649_v8 = vld [vmem:[%s2436_s2] ss:$0 sm:$0xff]  ;;  %s2104_s2 = smov 88   ;;  %s2105_s15 = smov 112   ;;  %vm2241_vm2 = vmpackc.low %vm207_vm1, %vm207_vm1  ;;  %v155_v32 = vshrl.u32 %v154_v31, 7 }
  0x16   :  { %1879 = vmatprep.subr.bf16.mxu1 %v1878_v3  ;;  %s2106_s16 = smov 80   ;;  %v158_v34 = vand.u32 127, %v154_v31  ;;  %s2107_s17 = smov 56   ;;  %vm1502_vm6 = vcmask 523264  }
  0x17   :  { %1881 = vmatpush3.bf16.msra.mxu1 %v1878_v3  ;;  %v156_v33 = vadd.s32 8, %v155_v32  ;;  %v163_v37 = vand.u32 1, %v155_v32  ;;  %s2108_s20 = smov 72   ;;  %s2109_s21 = smov 64  }
  0x18   :  { %1883 = vmatprep.subr.bf16.mxu1 %v1882_v6  ;;  %v187_v36 = vand.u32 1, %v158_v34  ;;  %s2110_s22 = smov 104   ;;  %s2111_s23 = smov 48  }
  0x19   :  { %v170_v35 = vand.u32 1, %v156_v33  ;;  %s2112_s24 = smov 40   ;;  %s2113_s25 = smov [#allocation5]  }
  0x1a   :  { %vm2267_vm4 = vcmp.eq.s32.totalorder %v163_v37, %v187_v36  ;;  %s1637_s27 = sshll.u32 %s2113_s25, 4  ;;  %s1638_s27 = int_to_ptr.vmem [resolvable:$true] %s1637_s27 }
  0x1b   :  { %1885 = vmatpush3.bf16.msra.mxu1 %v1882_v6  ;;  %vm2263_vm3 = vcmp.eq.s32.totalorder %v170_v35, %v187_v36  ;;  %s2073_s28 = scalar_lea.vmem %s1638_s27, 256  ;;  %p2078_p9 = scmp.lt.s32.totalorder %s1638_s27, %s1638_s27 }
  0x1c   :  { %p2074_p8 = scmp.ne.s32.totalorder %s1638_s27, %s2073_s28  ;;  %p2079_p10 = scmp.lt.s32.totalorder %s2073_s28, %s2073_s28 }
  0x1e   :  { %1770 = vmatmul.mubr.msk.f32.vlgmr.msra.gmra.mrb[0].mxu1 %vm72_vm0, %v2215_v7  ;;  %p2080_p11 = por %p2079_p10, %p2078_p9 }
  0x20   :  { %p2081_p12 = pnand %p2080_p11, %p2074_p8 }
  0xf1   :  { %v1771_v9 = vpop.f32.mrb[0].mxu1 }
  0xf2   :  { %v2222_v10 = vadd.f32 %v1771_v9, %v1649_v8  ;;  %v145_v11 = vpop.f32.mrb[1].mxu1 }
  0xf3   :  { %v2224_v12 = vadd.f32 %v1649_v8, %v145_v11 }
  0xf5   :  { %403 = vrot.lane.b32.xlu1 %v2224_v12, %s2102_s1  ;;  %1776 = vmatprep.mubr.msk.f32.mxu1 %vm207_vm1, %v2224_v12  ;;  %v2231_v13 = vpack.i.bf16 %v2222_v10, %v2224_v12 }
  0xf7   :  { %1972 = vrot.lane.b32.xlu0 %v2231_v13, %s2103_s14 }
  0xf9   :  { %405 = vrot.lane.b32.xlu1 %v2222_v10, %s2102_s1 }
  0xfb   :  { %1977 = vrot.lane.b32.xlu0 %v2231_v13, %s2104_s2 }
  0xfd   :  { %767 = vrot.lane.b32.xlu1 %v2224_v12, %s2105_s15 }
  0xff   :  { %1982 = vrot.lane.b32.xlu0 %v2231_v13, %s2106_s16 }
 0x103   :  { %769 = vrot.lane.b32.xlu0 %v2222_v10, %s2105_s15 }
 0x167   :  { %v404_v24 = vpop.permute.xlu1 %403 }
 0x169   :  { %v1973_v14 = vpop.permute.xlu0 %1972 }
 0x16a   :  { %v1975_v15 = vunpack.i.h.bf16 %v1973_v14  ;;  %v1974_v16 = vunpack.i.l.bf16 %v1973_v14 }
 0x16b   :  { %v406_v28 = vpop.permute.xlu1 %405 }
 0x16c   :  { %v1886_v18 = vpack.c.bf16 %v1975_v15, %v1974_v16 }
 0x16d   :  { %v1978_v19 = vpop.permute.xlu0 %1977 }
 0x16e   :  { %v1980_v20 = vunpack.i.h.bf16 %v1978_v19  ;;  %v1979_v21 = vunpack.i.l.bf16 %v1978_v19  ;;  %1888 = vmatprep.subr.msk.bf16.mxu1 %vm2241_vm2, %v1886_v18 }
 0x16f   :  { %1891 = vmatpush3.bf16.xpose.msk.msra.mxu1 %vm2241_vm2, %v1886_v18  ;;  %v768_v29 = vpop.permute.xlu1 %767 }
 0x170   :  { %v1896_v22 = vpack.c.bf16 %v1980_v20, %v1979_v21 }
 0x171   :  { %v1983_v23 = vpop.permute.xlu0 %1982 }
 0x172   :  { %v1985_v25 = vunpack.i.h.bf16 %v1983_v23  ;;  %v1984_v26 = vunpack.i.l.bf16 %v1983_v23  ;;  %1898 = vmatprep.subr.msk.bf16.mxu1 %vm2241_vm2, %v1896_v22 }
 0x174   :  { %v1906_v27 = vpack.c.bf16 %v1985_v25, %v1984_v26 }
 0x175   :  { %v770_v30 = vpop.permute.xlu0 %769 }
 0x176   :  { %1777 = vmatmul.mubr.msk.f32.vlgmr.msra.gmra.mrb[2].mxu1 %vm207_vm1, %v2222_v10 }
 0x177   :  { %1901 = vmatpush3.bf16.xpose.msk.msra.mxu1 %vm2241_vm2, %v1896_v22  ;;  %1790 = vmatprep.mubr.msk.f32.mxu1 %vm207_vm1, %v404_v24 }
 0x178   :  { %1908 = vmatprep.subr.msk.bf16.mxu1 %vm2241_vm2, %v1906_v27 }
 0x17e   :  { %1791 = vmatmul.mubr.msk.f32.vlgmr.msra.gmra.mrb[4].mxu1 %vm207_vm1, %v406_v28 }
 0x17f   :  { %1911 = vmatpush3.bf16.xpose.msk.msra.mxu1 %vm2241_vm2, %v1906_v27  ;;  %1814 = vmatprep.mubr.msk.f32.mxu1 %vm207_vm1, %v768_v29 }
 0x186   :  { %1815 = vmatmul.mubr.msk.f32.vlgmr.msra.gmra.mrb[6].mxu1 %vm207_vm1, %v770_v30 }
 0x249   :  { %v1778_v40 = vpop.f32.mrb[2].mxu1 }
 0x24a   :  { %v292_v41 = vsel %vm2263_vm3, %v1778_v40, -1e+30  ;;  %v282_v42 = vpop.f32.mrb[3].mxu1 }
 0x24b   :  { %v291_v43 = vsel %vm2267_vm4, %v282_v42, -1e+30  ;;  %v297_v44 = vsel %vm293_vm5, %v292_v41, -inf }
 0x24c   :  { %298 = vmax.xlane.f32.xlu0 %v297_v44  ;;  %v294_v45 = vsel %vm293_vm5, %v291_v43, -inf }
 0x24d   :  { %295 = vmax.xlane.f32.xlu1 %v294_v45 }
 0x251   :  { %v1792_v46 = vpop.f32.mrb[4].mxu1 }
 0x252   :  { %v495_v47 = vsel %vm2263_vm3, %v1792_v46, -1e+30  ;;  %v485_v48 = vpop.f32.mrb[5].mxu1 }
 0x253   :  { %v494_v49 = vsel %vm2267_vm4, %v485_v48, -1e+30  ;;  %v499_v50 = vsel %vm293_vm5, %v495_v47, -inf }
 0x254   :  { %500 = vmax.xlane.f32.xlu1 %v499_v50  ;;  %v496_v51 = vsel %vm293_vm5, %v494_v49, -inf }
 0x255   :  { %497 = vmax.xlane.f32.xlu0 %v496_v51 }
 0x259   :  { %v1816_v52 = vpop.f32.mrb[6].mxu1 }
 0x25a   :  { %v849_v53 = vpop.f32.mrb[7].mxu1  ;;  %v859_v16 = vsel %vm2263_vm3, %v1816_v52, -1e+30 }
 0x25b   :  { %v858_v15 = vsel %vm2267_vm4, %v849_v53, -1e+30  ;;  %v863_v19 = vsel %vm293_vm5, %v859_v16, -inf }
 0x25c   :  { %v860_v18 = vsel %vm293_vm5, %v858_v15, -inf }
 0x2d9   :  { %v299_v54 = vpop.xlane.xlu0 %298 }
 0x2da   :  { %v301_v55 = vsub.f32 %v292_v41, %v299_v54  ;;  %v296_v56 = vpop.xlane.xlu1 %295  ;;  %v198_v54 = vld [vmem:[%s2437_s3 + $0x8] sm:$0xff] }
 0x2db   :  { %v300_v57 = vsub.f32 %v291_v43, %v296_v56 }
 0x2dc   :  { %v304_v58 = vmul.f32 1.442695, %v301_v55  ;;  %v197_v55 = vld [vmem:[%s2437_s3] sm:$0xff] }
 0x2dd   :  { %v302_v59 = vmul.f32 1.442695, %v300_v57 }
 0x2de   :  { %2011 = vpow2.f32 %v304_v58 }
 0x2df   :  { %2013 = vpow2.f32 %v302_v59 }
 0x2e1   :  { %v501_v60 = vpop.xlane.xlu1 %500 }
 0x2e2   :  { %v503_v61 = vsub.f32 %v495_v47, %v501_v60  ;;  %v498_v62 = vpop.xlane.xlu0 %497 }
 0x2e3   :  { %v502_v63 = vsub.f32 %v494_v49, %v498_v62 }
 0x2e4   :  { %v506_v0 = vmul.f32 1.442695, %v503_v61 }
 0x2e5   :  { %v504_v1 = vmul.f32 1.442695, %v502_v63 }
 0x2e6   :  { %2015 = vpow2.f32 %v506_v0 }
 0x2e7   :  { %2017 = vpow2.f32 %v504_v1 }
 0x2e8   :  { %v2012_v2 = vpop.eup %2011 }
 0x2e9   :  { %v2014_v3 = vpop.eup %2013  ;;  %v309_v4 = vsel %vm293_vm5, %v2012_v2, 0.0 }
 0x2ea   :  { %310 = vadd.xlane.f32.xlu1 %v309_v4  ;;  %v306_v6 = vsel %vm293_vm5, %v2014_v3, 0.0 }
 0x2eb   :  { %307 = vadd.xlane.f32.xlu0 %v306_v6 }
 0x2f0   :  { %v2285_v8 = vpop.eup %2015 }
 0x2f1   :  { %v2018_v9 = vpop.eup %2017  ;;  %v511_v11 = vsel %vm293_vm5, %v2285_v8, 0.0 }
 0x2f2   :  { %512 = vadd.xlane.f32.xlu1 %v511_v11  ;;  %v508_v14 = vsel %vm293_vm5, %v2018_v9, 0.0 }
 0x2f3   :  { %509 = vadd.xlane.f32.xlu0 %v508_v14 }
 0x303   :  { %1992 = vrot.lane.b32.xlu1 %v2231_v13, %s2107_s17 }
 0x307   :  { %1997 = vrot.lane.b32.xlu1 %v2231_v13, %s2108_s20 }
 0x309   :  { %1987 = vrot.lane.b32.xlu0 %v2231_v13, %s2109_s21 }
 0x30b   :  { %1054 = vrot.lane.b32.xlu1 %v2222_v10, %s2110_s22 }
 0x30d   :  { %1052 = vrot.lane.b32.xlu0 %v2224_v12, %s2110_s22 }
 0x32c   :  { %861 = vmax.xlane.f32.xlu0 %v860_v18  ;;  %v199_v18 = vld [vmem:[%s2437_s3 + $0x10] sm:$0xff] }
 0x32f   :  { %864 = vmax.xlane.f32.xlu1 %v863_v19 }
 0x340   :  { %2002 = vrot.lane.b32.xlu1 %v2231_v13, %s2111_s23 }
 0x344   :  { %2007 = vrot.lane.b32.xlu1 %v2231_v13, %s2112_s24 }
 0x377   :  { %v311_v12 = vpop.xlane.xlu1 %310 }
 0x378   :  { %v308_v10 = vpop.xlane.xlu0 %307 }
 0x379   :  { %2019 = vrcp.f32 %v308_v10 }
 0x37a   :  { %2021 = vrcp.f32 %v311_v12 }
 0x37f   :  { %v513_v20 = vpop.xlane.xlu1 %512 }
 0x380   :  { %v510_v21 = vpop.xlane.xlu0 %509 }
 0x381   :  { %2023 = vrcp.f32 %v510_v21 }
 0x382   :  { %2025 = vrcp.f32 %v513_v20 }
 0x383   :  { %v2020_v22 = vpop.eup %2019  ;;  %v1993_v23 = vpop.permute.xlu1 %1992 }
 0x384   :  { %v1988_v24 = vpop.permute.xlu0 %1987  ;;  %v313_v25 = vmul.f32 %v2020_v22, %v2014_v3  ;;  %v1995_v26 = vunpack.i.h.bf16 %v1993_v23  ;;  %v1994_v27 = vunpack.i.l.bf16 %v1993_v23  ;;  %v2022_v31 = vpop.eup %2021 }
 0x385   :  { %v1990_v28 = vunpack.i.h.bf16 %v1988_v24  ;;  %v1989_v29 = vunpack.i.l.bf16 %v1988_v24  ;;  %v315_v40 = vmul.f32 %v2022_v31, %v2012_v2 }
 0x386   :  { %1783 = vmatprep.mubr.msk.f32.mxu0 %vm293_vm5, %v313_v25  ;;  %v1902_v35 = vpack.c.bf16 %v1995_v26, %v1994_v27 }
 0x387   :  { %v1998_v30 = vpop.permute.xlu1 %1997  ;;  %v1892_v13 = vpack.c.bf16 %v1990_v28, %v1989_v29 }
 0x388   :  { %v2000_v32 = vunpack.i.h.bf16 %v1998_v30  ;;  %v1999_v33 = vunpack.i.l.bf16 %v1998_v30  ;;  %v1053_v34 = vpop.permute.xlu0 %1052 }
 0x389   :  { %1893 = vmatprep.subr.bf16.mxu0 %v1892_v13  ;;  %1833 = vmatprep.mubr.msk.f32.mxu1 %vm207_vm1, %v1053_v34 }
 0x38a   :  { %v1916_v36 = vpack.c.bf16 %v2000_v32, %v1999_v33  ;;  %1895 = vmatpush3.bf16.msra.mxu0 %v1892_v13  ;;  %v200_v13 = vld [vmem:[%s2437_s3 + $0x18] sm:$0xff] }
 0x38b   :  { %v2024_v37 = vpop.eup %2023  ;;  %1903 = vmatprep.subr.bf16.mxu0 %v1902_v35  ;;  %v1055_v44 = vpop.permute.xlu1 %1054 }
 0x38c   :  { %v2026_v41 = vpop.eup %2025  ;;  %1918 = vmatprep.subr.msk.bf16.mxu1 %vm2241_vm2, %v1916_v36  ;;  %v515_v42 = vmul.f32 %v2024_v37, %v2018_v9 }
 0x38d   :  { %1784 = vmatmul.mubr.msk.f32.vlgmr.msra.gmra.mrb[0].mxu0 %vm293_vm5, %v315_v40  ;;  %1921 = vmatpush3.bf16.xpose.msk.msra.mxu1 %vm2241_vm2, %v1916_v36  ;;  %v517_v43 = vmul.f32 %v2026_v41, %v2285_v8  ;;  %v1684_v41 = vld [vmem:[%s2438_s4] ss:$0 sm:$0xff] }
 0x38e   :  { %1905 = vmatpush3.bf16.msra.mxu0 %v1902_v35  ;;  %1797 = vmatprep.mubr.msk.f32.mxu0 %vm293_vm5, %v515_v42 }
 0x38f   :  { %1800 = vmatprep.subr.mxu0 %v198_v54 }
 0x391   :  { %1798 = vmatmul.mubr.msk.f32.vlgmr.msra.gmra.mrb[2].mxu0 %vm293_vm5, %v517_v43 }
 0x392   :  { %1801 = vmatpush3.msra.mxu0 %v198_v54 }
 0x393   :  { %1805 = vmatprep.subr.mxu0 %v197_v55 }
 0x394   :  { %1834 = vmatmul.mubr.msk.f32.vlgmr.msra.gmra.mrb[8].mxu1 %vm207_vm1, %v1055_v44 }
 0x3b9   :  { %v862_v45 = vpop.xlane.xlu0 %861 }
 0x3ba   :  { %v866_v46 = vsub.f32 %v858_v15, %v862_v45 }
 0x3bc   :  { %v868_v47 = vmul.f32 1.442695, %v866_v46  ;;  %v865_v48 = vpop.xlane.xlu1 %864 }
 0x3bd   :  { %v867_v49 = vsub.f32 %v859_v16, %v865_v48 }
 0x3be   :  { %2027 = vpow2.f32 %v868_v47 }
 0x3bf   :  { %v870_v50 = vmul.f32 1.442695, %v867_v49 }
 0x3c0   :  { %v2003_v57 = vpop.permute.xlu1 %2002 }
 0x3c1   :  { %2029 = vpow2.f32 %v870_v50  ;;  %v2005_v61 = vunpack.i.h.bf16 %v2003_v57  ;;  %v2004_v62 = vunpack.i.l.bf16 %v2003_v57 }
 0x3c3   :  { %v1912_v1 = vpack.c.bf16 %v2005_v61, %v2004_v62  ;;  %v1396_v61 = vld [vmem:[%s2441_s7 + $0x18] sm:$0xff] }
 0x3c4   :  { %v2008_v11 = vpop.permute.xlu1 %2007 }
 0x3c5   :  { %v2010_v19 = vunpack.i.h.bf16 %v2008_v11  ;;  %v2009_v10 = vunpack.i.l.bf16 %v2008_v11 }
 0x3c7   :  { %v1922_v39 = vpack.c.bf16 %v2010_v19, %v2009_v10 }
 0x3c8   :  { %v2028_v17 = vpop.eup %2027 }
 0x3c9   :  { %v872_v51 = vsel %vm293_vm5, %v2028_v17, 0.0 }
 0x3ca   :  { %873 = vadd.xlane.f32.xlu0 %v872_v51 }
 0x3cb   :  { %v2030_v52 = vpop.eup %2029 }
 0x3cc   :  { %v875_v53 = vsel %vm293_vm5, %v2030_v52, 0.0 }
 0x3ce   :  { %876 = vadd.xlane.f32.xlu0 %v875_v53 }
 0x457   :  { %v874_v56 = vpop.xlane.xlu0 %873 }
 0x458   :  { %2031 = vrcp.f32 %v874_v56 }
 0x45b   :  { %v877_v59 = vpop.xlane.xlu0 %876 }
 0x45c   :  { %2033 = vrcp.f32 %v877_v59 }
 0x460   :  { %v1785_v58 = vpop.f32.mrb[0].mxu0 }
 0x461   :  { %v394_v60 = vpop.f32.mrb[1].mxu0 }
 0x462   :  { %v2032_v8 = vpop.eup %2031 }
 0x463   :  { %v879_v16 = vmul.f32 %v2032_v8, %v2028_v17  ;;  %v1492_v8 = vld [vmem:[%s2443_s9 + $0x28] sm:$0xff] }
 0x464   :  { %v1799_v63 = vpop.f32.mrb[2].mxu0 }
 0x465   :  { %v596_v0 = vpop.f32.mrb[3].mxu0 }
 0x466   :  { %1802 = vmatprep.mubr.msk.f32.mxu0 %vm207_vm1, %v596_v0  ;;  %v2034_v14 = vpop.eup %2033  ;;  %v1488_v0 = vld [vmem:[%s2443_s9 + $0x8] sm:$0xff] }
 0x467   :  { %1803 = vmatmul.mubr.msk.f32.vlgmr.msra.gmra.mrb[4].mxu0 %vm207_vm1, %v1799_v63  ;;  %v1835_v2 = vpop.f32.mrb[8].mxu1  ;;  %v881_v38 = vmul.f32 %v2034_v14, %v2030_v52  ;;  %v1487_v63 = vld [vmem:[%s2443_s9] sm:$0xff] }
 0x468   :  { %1806 = vmatpush3.msra.mxu0 %v197_v55  ;;  %1807 = vmatprep.mubr.msk.f32.mxu0 %vm207_vm1, %v394_v60  ;;  %v1134_v3 = vpop.f32.mrb[9].mxu1  ;;  %v1144_v9 = vsel %vm2263_vm3, %v1835_v2, -1e+30  ;;  %v1395_v60 = vld [vmem:[%s2441_s7 + $0x10] sm:$0xff]  ;;  %v1934_v2 = vpack.c.bf16 %v1488_v0, %v1487_v63 }
 0x469   :  { %1913 = vmatprep.subr.bf16.mxu0 %v1912_v1  ;;  %v1143_v4 = vsel %vm2267_vm4, %v1134_v3, -1e+30  ;;  %v1148_v15 = vsel %vm293_vm5, %v1144_v9, -inf  ;;  %v1930_v62 = vpack.c.bf16 %v1396_v61, %v1395_v60  ;;  %v1490_v3 = vld [vmem:[%s2443_s9 + $0x18] sm:$0xff]  ;;  %v1693_v60 = vld [vmem:[%s2445_s11] ss:$0 sm:$0xff] }
 0x46a   :  { %v1145_v6 = vsel %vm293_vm5, %v1143_v4, -inf }
 0x46b   :  { %1146 = vmax.xlane.f32.xlu0 %v1145_v6  ;;  %v1491_v6 = vld [vmem:[%s2443_s9 + $0x20] sm:$0xff] }
 0x46f   :  { %1149 = vmax.xlane.f32.xlu0 %v1148_v15  ;;  %1808 = vmatmul.mubr.msk.f32.vlgmr.msra.gmra.mrb[4].mxu0 %vm207_vm1, %v1785_v58  ;;  %v1394_v58 = vld [vmem:[%s2441_s7 + $0x8] sm:$0xff] }
 0x470   :  { %1915 = vmatpush3.bf16.msra.mxu0 %v1912_v1  ;;  %1821 = vmatprep.mubr.msk.f32.mxu0 %vm293_vm5, %v879_v16  ;;  %v1489_v1 = vld [vmem:[%s2443_s9 + $0x10] sm:$0xff] }
 0x471   :  { %1824 = vmatprep.subr.mxu0 %v199_v18 }
 0x473   :  { %1822 = vmatmul.mubr.msk.f32.vlgmr.msra.gmra.mrb[6].mxu0 %vm293_vm5, %v881_v38  ;;  %v1685_v38 = vld [vmem:[%s2439_s5] ss:$0 sm:$0xff] }
 0x474   :  { %1825 = vmatpush3.msra.mxu0 %v199_v18 }
 0x475   :  { %1923 = vmatprep.subr.bf16.mxu0 %v1922_v39 }
 0x4f8   :  { %v1147_v12 = vpop.xlane.xlu0 %1146 }
 0x4f9   :  { %v1151_v20 = vsub.f32 %v1143_v4, %v1147_v12  ;;  %v1938_v4 = vpack.c.bf16 %v1490_v3, %v1489_v1  ;;  %v1686_v12 = vld [vmem:[%s2440_s6] ss:$0 sm:$0xff] }
 0x4fb   :  { %v1153_v21 = vmul.f32 1.442695, %v1151_v20 }
 0x4fc   :  { %v1150_v22 = vpop.xlane.xlu0 %1149 }
 0x4fd   :  { %2035 = vpow2.f32 %v1153_v21  ;;  %v1152_v23 = vsub.f32 %v1144_v9, %v1150_v22  ;;  %v1942_v9 = vpack.c.bf16 %v1492_v8, %v1491_v6 }
 0x4ff   :  { %v1155_v24 = vmul.f32 1.442695, %v1152_v23 }
 0x501   :  { %2037 = vpow2.f32 %v1155_v24 }
 0x507   :  { %v2036_v25 = vpop.eup %2035 }
 0x508   :  { %v1157_v26 = vsel %vm293_vm5, %v2036_v25, 0.0 }
 0x509   :  { %1158 = vadd.xlane.f32.xlu0 %v1157_v26  ;;  %v1493_v26 = vld [vmem:[%s2443_s9 + $0x30] sm:$0xff] }
 0x50b   :  { %v2038_v27 = vpop.eup %2037 }
 0x50c   :  { %v1160_v28 = vsel %vm293_vm5, %v2038_v27, 0.0 }
 0x50d   :  { %1161 = vadd.xlane.f32.xlu0 %v1160_v28 }
 0x546   :  { %v1823_v29 = vpop.f32.mrb[6].mxu0 }
 0x547   :  { %v960_v30 = vpop.f32.mrb[7].mxu0 }
 0x548   :  { %1826 = vmatprep.mubr.msk.f32.mxu0 %vm207_vm1, %v960_v30 }
 0x549   :  { %1827 = vmatmul.mubr.msk.f32.vlgmr.msra.gmra.mrb[4].mxu0 %vm207_vm1, %v1823_v29  ;;  %v1687_v29 = vld [vmem:[%s2442_s8] ss:$0 sm:$0xff] }
 0x54a   :  { %1925 = vmatpush3.bf16.msra.mxu0 %v1922_v39 }
 0x54b   :  { %1843 = vmatprep.subr.mxu0 %v200_v13 }
 0x596   :  { %v1159_v31 = vpop.xlane.xlu0 %1158 }
 0x597   :  { %2039 = vrcp.f32 %v1159_v31 }
 0x59a   :  { %v1162_v32 = vpop.xlane.xlu0 %1161 }
 0x59b   :  { %2041 = vrcp.f32 %v1162_v32 }
 0x5a1   :  { %v2040_v33 = vpop.eup %2039 }
 0x5a2   :  { %v1164_v34 = vmul.f32 %v2040_v33, %v2036_v25 }
 0x5a4   :  { %1840 = vmatprep.mubr.msk.f32.mxu0 %vm293_vm5, %v1164_v34 }
 0x5a5   :  { %v2042_v35 = vpop.eup %2041 }
 0x5a6   :  { %v1166_v36 = vmul.f32 %v2042_v35, %v2038_v27  ;;  %v1494_v27 = vld [vmem:[%s2443_s9 + $0x38] sm:$0xff]  ;;  %v1690_v35 = vld [vmem:[%s2444_s10] ss:$0 sm:$0xff] }
 0x5a7   :  { %v1946_v28 = vpack.c.bf16 %v1494_v27, %v1493_v26 }
 0x5a8   :  { %1841 = vmatmul.mubr.msk.f32.vlgmr.msra.gmra.mrb[8].mxu0 %vm293_vm5, %v1166_v36 }
 0x5a9   :  { %1844 = vmatpush3.msra.mxu0 %v200_v13 }
 0x5aa   :  { %1935 = vmatprep.subr.bf16.mxu0 %v1934_v2 }
 0x67b   :  { %v1842_v37 = vpop.f32.mrb[8].mxu0 }
 0x67c   :  { %v1245_v40 = vpop.f32.mrb[9].mxu0 }
 0x67d   :  { %1845 = vmatprep.mubr.msk.f32.mxu0 %vm207_vm1, %v1245_v40 }
 0x67e   :  { %1846 = vmatmul.mubr.msk.f32.vlgmr.msra.gmra.mrb[4].mxu0 %vm207_vm1, %v1842_v37 }
 0x67f   :  { %1937 = vmatpush3.bf16.msra.mxu0 %v1934_v2 }
 0x680   :  { %1939 = vmatprep.subr.bf16.mxu0 %v1938_v4 }
 0x683   :  { %1941 = vmatpush3.bf16.msra.mxu0 %v1938_v4 }
 0x684   :  { %1943 = vmatprep.subr.bf16.mxu0 %v1942_v9 }
 0x687   :  { %1945 = vmatpush3.bf16.msra.mxu0 %v1942_v9 }
 0x688   :  { %1947 = vmatprep.subr.bf16.mxu0 %v1946_v28 }
 0x68b   :  { %1949 = vmatpush3.bf16.msra.mxu0 %v1946_v28 }
 0x751   :  { %v1847_v42 = vpop.f32.mrb[4].mxu0 }
 0x752   :  { %v1345_v43 = vadd.f32 %v1847_v42, %v1684_v41  ;;  %v1326_v44 = vpop.f32.mrb[5].mxu0 }
 0x753   :  { %v1344_v45 = vadd.f32 %v1684_v41, %v1326_v44 }
 0x754   :  { %v1347_v46 = vadd.f32 %v1345_v43, %v2215_v7 }
 0x755   :  { %v1346_v47 = vadd.f32 %v1344_v45, %v2211_v5  ;;  %v1393_v5 = vld [vmem:[%s2441_s7] sm:$0xff] }
 0x756   :  { %v1351_v48 = vsel %vm72_vm0, %v1347_v46, 0.0  ;;  %v1926_v59 = vpack.c.bf16 %v1394_v58, %v1393_v5 }
 0x757   :  { %1352 = vadd.xlane.f32.xlu1 %v1351_v48  ;;  %v1348_v49 = vsel %vm72_vm0, %v1346_v47, 0.0 }
 0x758   :  { %1349 = vadd.xlane.f32.xlu0 %v1348_v49  ;;  %1927 = vmatprep.subr.bf16.mxu1 %v1926_v59 }
 0x759   :  { %1929 = vmatpush3.bf16.msra.mxu1 %v1926_v59 }
 0x75a   :  { %1931 = vmatprep.subr.bf16.mxu1 %v1930_v62 }
 0x75d   :  { %1933 = vmatpush3.bf16.msra.mxu1 %v1930_v62  ;;  %v1694_v62 = vld [vmem:[%s2446_s12] ss:$0 sm:$0xff] }
 0x7e4   :  { %v1353_v50 = vpop.xlane.xlu1 %1352 }
 0x7e5   :  { %v1356_v17 = vmul.f32 0.03125, %v1353_v50  ;;  %v1350_v51 = vpop.xlane.xlu0 %1349 }
 0x7e6   :  { %v1355_v52 = vmul.f32 0.03125, %v1350_v51 }
 0x7e7   :  { %v1358_v53 = vsub.f32 %v1347_v46, %v1356_v17 }
 0x7e8   :  { %v1357_v54 = vsub.f32 %v1346_v47, %v1355_v52 }
 0x7e9   :  { %v1360_v57 = vmul.f32 %v1358_v53, %v1358_v53 }
 0x7ea   :  { %v1359_v55 = vmul.f32 %v1357_v54, %v1357_v54 }
 0x7eb   :  { %v1364_v7 = vsel %vm72_vm0, %v1360_v57, 0.0 }
 0x7ec   :  { %v1361_v56 = vsel %vm72_vm0, %v1359_v55, 0.0 }
 0x7ed   :  { %1362 = vadd.xlane.f32.xlu0 %v1361_v56 }
 0x7f1   :  { %1365 = vadd.xlane.f32.xlu0 %v1364_v7 }
 0x87a   :  { %v1363_v11 = vpop.xlane.xlu0 %1362 }
 0x87b   :  { %v1367_v14 = vmul.f32 0.03125, %v1363_v11 }
 0x87d   :  { %v1369_v15 = vadd.f32 1e-05, %v1367_v14 }
 0x87e   :  { %v1366_v16 = vpop.xlane.xlu0 %1365 }
 0x87f   :  { %2043 = vrsqrt.f32 %v1369_v15  ;;  %v1368_v18 = vmul.f32 0.03125, %v1366_v16 }
 0x881   :  { %v1370_v19 = vadd.f32 1e-05, %v1368_v18 }
 0x883   :  { %2045 = vrsqrt.f32 %v1370_v19 }
 0x889   :  { %v2044_v10 = vpop.eup %2043 }
 0x88a   :  { %v1373_v39 = vmul.f32 %v2044_v10, %v1357_v54 }
 0x88c   :  { %v1382_v20 = vmul.f32 %v1685_v38, %v1373_v39 }
 0x88d   :  { %v2046_v21 = vpop.eup %2045 }
 0x88e   :  { %v1374_v22 = vmul.f32 %v2046_v21, %v1358_v53  ;;  %v1391_v23 = vadd.f32 %v1686_v12, %v1382_v20 }
 0x890   :  { %v1383_v24 = vmul.f32 %v1685_v38, %v1374_v22  ;;  %1856 = vmatprep.mubr.msk.f32.mxu1 %vm72_vm0, %v1391_v23 }
 0x892   :  { %v1392_v25 = vadd.f32 %v1686_v12, %v1383_v24 }
 0x894   :  { %1857 = vmatmul.mubr.msk.f32.vlgmr.msra.gmra.mrb[10].mxu1 %vm72_vm0, %v1392_v25 }
 0x967   :  { %v1858_v30 = vpop.f32.mrb[10].mxu1 }
 0x968   :  { %v1482_v13 = vadd.f32 %v1858_v30, %v1687_v29  ;;  %v1476_v31 = vpop.f32.mrb[11].mxu1 }
 0x969   :  { %v1477_v32 = vadd.f32 %v1687_v29, %v1476_v31 }
 0x96a   :  { %v1486_v34 = vmax.f32 %v1482_v13, 0.0 }
 0x96b   :  { %v1485_v33 = vmax.f32 %v1477_v32, 0.0 }
 0x96d   :  { %1875 = vmatprep.mubr.msk.f32.mxu0 %vm1502_vm6, %v1485_v33 }
 0x96e   :  { %1876 = vmatmul.mubr.msk.f32.vlgmr.msra.gmra.mrb[10].mxu0 %vm1502_vm6, %v1486_v34 }
 0xa41   :  { %v1877_v36 = vpop.f32.mrb[10].mxu0 }
 0xa42   :  { %v1575_v37 = vpop.f32.mrb[11].mxu0  ;;  %v1581_v40 = vadd.f32 %v1877_v36, %v1690_v35 }
 0xa43   :  { %v1576_v41 = vadd.f32 %v1690_v35, %v1575_v37 }
 0xa44   :  { %v1585_v44 = vadd.f32 %v1581_v40, %v1392_v25 }
 0xa45   :  { %v1584_v42 = vadd.f32 %v1576_v41, %v1391_v23 }
 0xa46   :  { %v1589_v45 = vsel %vm72_vm0, %v1585_v44, 0.0 }
 0xa47   :  { %v1586_v43 = vsel %vm72_vm0, %v1584_v42, 0.0 }
 0xa48   :  { %1587 = vadd.xlane.f32.xlu0 %v1586_v43 }
 0xa4c   :  { %1590 = vadd.xlane.f32.xlu0 %v1589_v45 }
 0xad5   :  { %v1588_v46 = vpop.xlane.xlu0 %1587 }
 0xad6   :  { %v1592_v47 = vmul.f32 0.03125, %v1588_v46 }
 0xad8   :  { %v1594_v48 = vsub.f32 %v1584_v42, %v1592_v47 }
 0xad9   :  { %v1591_v49 = vpop.xlane.xlu0 %1590 }
 0xada   :  { %v1593_v50 = vmul.f32 0.03125, %v1591_v49  ;;  %v1596_v17 = vmul.f32 %v1594_v48, %v1594_v48 }
 0xadc   :  { %v1595_v51 = vsub.f32 %v1585_v44, %v1593_v50  ;;  %v1598_v52 = vsel %vm72_vm0, %v1596_v17, 0.0 }
 0xadd   :  { %1599 = vadd.xlane.f32.xlu0 %v1598_v52 }
 0xade   :  { %v1597_v53 = vmul.f32 %v1595_v51, %v1595_v51 }
 0xae0   :  { %v1601_v54 = vsel %vm72_vm0, %v1597_v53, 0.0 }
 0xae1   :  { %1602 = vadd.xlane.f32.xlu0 %v1601_v54 }
 0xb6a   :  { %v1600_v55 = vpop.xlane.xlu0 %1599 }
 0xb6b   :  { %v1604_v56 = vmul.f32 0.03125, %v1600_v55 }
 0xb6d   :  { %v1606_v57 = vadd.f32 1e-05, %v1604_v56 }
 0xb6e   :  { %v1603_v7 = vpop.xlane.xlu0 %1602 }
 0xb6f   :  { %2047 = vrsqrt.f32 %v1606_v57  ;;  %v1605_v5 = vmul.f32 0.03125, %v1603_v7 }
 0xb71   :  { %v1607_v58 = vadd.f32 1e-05, %v1605_v5 }
 0xb73   :  { %2049 = vrsqrt.f32 %v1607_v58 }
 0xb79   :  { %v2048_v59 = vpop.eup %2047 }
 0xb7a   :  { %v1610_v61 = vmul.f32 %v2048_v59, %v1594_v48 }
 0xb7c   :  { %v1619_v63 = vmul.f32 %v1693_v60, %v1610_v61 }
 0xb7d   :  { %v2050_v0 = vpop.eup %2049 }
 0xb7e   :  { %v1611_v1 = vmul.f32 %v2050_v0, %v1595_v51  ;;  %v1628_v2 = vadd.f32 %v1694_v62, %v1619_v63 }
 0xb80   :  { %v1620_v3 = vmul.f32 %v1693_v60, %v1611_v1  ;;  %1630 = vst.msk [vmem:[#allocation5] sm:$0xff] %vm72_vm0, %v1628_v2 }
 0xb82   :  { %v1629_v4 = vadd.f32 %v1694_v62, %v1620_v3 }
 0xb84   :  { %1631 = vst.msk [vmem:[#allocation5 + $0x8] sm:$0xff] %vm72_vm0, %v1629_v4 }
 0xb85   :  { %2084 = shalt.err (!%p2081_p12)
}
 0xb86   :  { %s2085_s29 = scalar_lea.hbm %s2447_s13, 256 }
 0xb87   :  { %p2086_p13 = scmp.ne.s32.totalorder %s2447_s13, %s2085_s29  ;;  %p2089_p0 = scmp.lt.u32.totalorder %s2085_s29, %s2447_s13 }
 0xb89   :  { %p2091_p1 = pnand %p2089_p0, %p2086_p13 }
 0xb8b   :  { %2094 = shalt.err (!%p2091_p1)
}
 0xb8c   :  { %1643 = dma.vmem_to_hbm [thread:$0]  %s1638_s27, 256, %s2447_s13, [#allocation4], %s2100_s18, %s2100_s18, %s2101_s19  }
 0xb8d   :  { %2097 = dma.done.wait [#allocation4], 256  }
 0xb8e   :  { %2098 = vsyncadd [#allocation4], 4294967040 }
 0xb8f   :  { %1647 = vsyncpa [#allocation3], 1 }
 0xb90   :  { %1648 = vsyncpa [#allocation4], 1 }

</bundles_post_ra>
